<compile_context>
chip_gen: v6e
topology: v6e:2x2x1
jax: 0.10.0
libtpu: 0.0.40
codegen_flags: <defaults>
</compile_context>

<pallas_src>
import jax
import jax.numpy as jnp
from jax import lax
from jax.experimental import pallas as pl
from jax.experimental.pallas import tpu as pltpu

_LANE = 128


def _linear_kernel(x_ref, w_ref, b_ref, o_ref, acc_ref):
    # x_ref:   (tb, tf) input dtype, VMEM   (batch tile x feature tile)
    # w_ref:   (1, tf)  input dtype, VMEM   (weight slice, PyTorch (1, F) layout)
    # b_ref:   (1,)     f32, SMEM           (bias scalar)
    # o_ref:   (1, tb)  input dtype, VMEM   (lane-dense output row block)
    # acc_ref: (1, tb)  f32 VMEM scratch    (accumulator over the F grid axis)
    k = pl.program_id(1)

    @pl.when(k == 0)
    def _init():
        acc_ref[...] = jnp.zeros_like(acc_ref)

    # (1, tf) contracted with (tb, tf) on the feature axis -> (1, tb).
    # MXU matmul, f32 accumulation, lane-dense result; the MXU is otherwise idle here,
    # so this frees the VPU/XLU slots entirely for the (HBM-bound) streaming pipeline.
    acc_ref[...] += lax.dot_general(
        w_ref[...], x_ref[...],
        dimension_numbers=(((1,), (1,)), ((), ())),
        preferred_element_type=jnp.float32,
    )

    @pl.when(k == pl.num_programs(1) - 1)
    def _finalize():
        o_ref[...] = (acc_ref[...] + b_ref[0]).astype(o_ref.dtype)


def _round_up(x, m):
    return ((x + m - 1) // m) * m


def _pick_block_cols(F, itemsize, tile_budget_bytes, min_rows=256):
    """Feature-tile width: divides F, multiple of 128, keeps a min_rows-row tile in budget."""
    max_cols = tile_budget_bytes // (itemsize * min_rows)
    if F <= max_cols:
        return F
    tf = (max_cols // _LANE) * _LANE
    while tf >= _LANE:
        if F % tf == 0:
            return tf
        tf -= _LANE
    # TODO(synk): ragged feature tiles would need masking of the contraction tail; fall
    # back to a single (possibly over-budget) F tile rather than risk a wrong answer.
    return F


def logistic_regression_forward(x, weight, bias, *, block_rows=None, block_cols=None):
    """x: (B, F); weight: (1, F) (PyTorch layout); bias: (1,). Returns (B, 1) in x.dtype."""
    B, F = x.shape
    assert weight.shape == (1, F)
    assert bias.shape == (1,)
    itemsize = jnp.dtype(x.dtype).itemsize

    # ~8 MiB per X tile; Pallas double-buffers it, so <= ~16 MiB of streaming VMEM plus
    # tiny weight/output/acc buffers, comfortably inside the 32 MiB scoped-VMEM limit
    # requested below (valid on v5e, v6e and v7x).
    tile_budget_bytes = 8 * 1024 * 1024

    # Feature (contraction) tile.
    if (block_cols is not None and F % int(block_cols) == 0
            and (int(block_cols) == F or int(block_cols) % _LANE == 0)):
        tf = int(block_cols)
    else:
        tf = _pick_block_cols(F, itemsize, tile_budget_bytes)
    nf = F // tf

    # Batch tile: largest multiple of 128 rows within the byte budget (no artificial cap
    # below 16384 rows, so large batches hit the ~85%-of-roofline tile regime).
    if block_rows is None:
        tb = (tile_budget_bytes // max(tf * itemsize, 1)) // _LANE * _LANE
        tb = int(min(max(tb, _LANE), 16384))
    else:
        tb = int(max(_LANE, _round_up(int(block_rows), _LANE)))

    if tb >= B:
        # Single full-extent row block (exempt from the 8/128 divisibility rule) ...
        tb = B
        if B >= 512:
            # ... unless splitting in two lets v7x's second TensorCore do real work.
            tb = _round_up(pl.cdiv(B, 2), _LANE)
    nb = pl.cdiv(B, tb)  # ragged last block is masked by Pallas; no wrapper-side pad.

    out_row = pl.pallas_call(
        _linear_kernel,
        out_shape=jax.ShapeDtypeStruct((1, B), x.dtype),
        grid_spec=pltpu.PrefetchScalarGridSpec(
            num_scalar_prefetch=0,
            grid=(nb, nf),
            in_specs=[
                pl.BlockSpec((tb, tf), lambda i, k: (i, k)),           # X tiles (pipelined)
                pl.BlockSpec((1, tf), lambda i, k: (0, k)),            # weight slice
                pl.BlockSpec(memory_space=pltpu.MemorySpace.SMEM),     # bias scalar
            ],
            out_specs=pl.BlockSpec((1, tb), lambda i, k: (0, i)),      # lane-dense row
            scratch_shapes=[pltpu.VMEM((1, tb), jnp.float32)],
        ),
        compiler_params=pltpu.CompilerParams(
            dimension_semantics=("parallel", "arbitrary"),
            vmem_limit_bytes=32 * 1024 * 1024,
        ),
    )(x, weight.astype(x.dtype), bias.astype(jnp.float32))

    return out_row.reshape(B, 1)


if __name__ == "__main__":
    key = jax.random.PRNGKey(0)
    kx, kw, kb, kx2, kw2 = jax.random.split(key, 5)

    # Inputs are rounded to bf16-representable values so the exact-f32 reference and the
    # MXU path agree to f32 accumulation rounding regardless of matmul precision mode.
    def _bf16_exact(a):
        return a.astype(jnp.bfloat16).astype(jnp.float32)

    # Case 1: batch not a multiple of the row tile -> exercises the ragged edge block.
    batch, in_features = 300, 128
    bound = 1.0 / jnp.sqrt(jnp.float32(in_features))
    x = _bf16_exact(jax.random.normal(kx, (batch, in_features), dtype=jnp.float32))
    weight = _bf16_exact(jax.random.uniform(kw, (1, in_features), dtype=jnp.float32,
                                            minval=-bound, maxval=bound))
    bias = jax.random.uniform(kb, (1,), dtype=jnp.float32, minval=-bound, maxval=bound)

    ref = (x * weight).sum(axis=-1, keepdims=True) + bias  # exact f32 reference

    out = jax.block_until_ready(logistic_regression_forward(x, weight, bias))
    assert out.shape == (batch, 1)
    assert jnp.allclose(out, ref, atol=1e-5, rtol=1e-5)

    out_tiled = jax.block_until_ready(
        logistic_regression_forward(x, weight, bias, block_rows=128))
    assert jnp.allclose(out_tiled, ref, atol=1e-5, rtol=1e-5)

    # Case 2: feature-axis ("arbitrary") accumulation path with pl.when init/finalize.
    in_features2 = 256
    bound2 = 1.0 / jnp.sqrt(jnp.float32(in_features2))
    x2 = _bf16_exact(jax.random.normal(kx2, (batch, in_features2), dtype=jnp.float32))
    weight2 = _bf16_exact(jax.random.uniform(kw2, (1, in_features2), dtype=jnp.float32,
                                             minval=-bound2, maxval=bound2))
    ref2 = (x2 * weight2).sum(axis=-1, keepdims=True) + bias

    out2 = jax.block_until_ready(
        logistic_regression_forward(x2, weight2, bias, block_rows=128, block_cols=128))
    assert out2.shape == (batch, 1)
    assert jnp.allclose(out2, ref2, atol=1e-5, rtol=1e-5)

    print("KERNEL_OK")
</pallas_src>

<mosaic_0001>
module attributes {stable_mosaic.version = 11 : i64} {
  func.func @_linear_kernel(%arg0: i32, %arg1: i32, %arg2: memref<300x128xf32, #tpu.memory_space<vmem>>, %arg3: memref<1x128xf32, #tpu.memory_space<vmem>>, %arg4: memref<1xf32, #tpu.memory_space<smem>>, %arg5: memref<1x300xf32, #tpu.memory_space<vmem>>, %arg6: memref<1x300xf32, #tpu.memory_space<vmem>>) attributes {dimension_semantics = [#tpu.dimension_semantics<parallel>, #tpu.dimension_semantics<arbitrary>], iteration_bounds = array<i64: 1, 1>, scalar_prefetch = 0 : i64, scratch_operands = 1 : i64, tpu.core_type = #tpu.core_type<tc>, window_params = [{transform_indices = @transform_0, window_bounds = array<i64: 300, 128>}, {transform_indices = @transform_1, window_bounds = array<i64: 1, 128>}, {transform_indices = @transform_2, window_bounds = array<i64: 1>}, {transform_indices = @transform_3, window_bounds = array<i64: 1, 300>}]} {
    %c0_i32 = arith.constant 0 : i32
    %0 = arith.cmpi eq, %arg1, %c0_i32 : i32
    %1 = arith.extui %0 : i1 to i32
    %c0_i32_0 = arith.constant 0 : i32
    %2 = arith.cmpi ne, %1, %c0_i32_0 : i32
    scf.if %2 {
      %cst_10 = arith.constant 0.000000e+00 : f32
      %12 = vector.broadcast %cst_10 : f32 to vector<1x300xf32>
      %c0_11 = arith.constant 0 : index
      %c0_12 = arith.constant 0 : index
      %13 = vector.load %arg6[%c0_11, %c0_12] : memref<1x300xf32, #tpu.memory_space<vmem>>, vector<1x300xf32>
      tpu.vector_store %arg6[%c0_11, %c0_12], %12 {strides = array<i32>} : memref<1x300xf32, #tpu.memory_space<vmem>>, vector<1x300xf32>,
    } else {
    }
    %c0 = arith.constant 0 : index
    %c0_1 = arith.constant 0 : index
    %3 = vector.load %arg6[%c0, %c0_1] : memref<1x300xf32, #tpu.memory_space<vmem>>, vector<1x300xf32>
    %c0_2 = arith.constant 0 : index
    %c0_3 = arith.constant 0 : index
    %4 = vector.load %arg3[%c0_2, %c0_3] : memref<1x128xf32, #tpu.memory_space<vmem>>, vector<1x128xf32>
    %c0_4 = arith.constant 0 : index
    %c0_5 = arith.constant 0 : index
    %5 = vector.load %arg2[%c0_4, %c0_5] : memref<300x128xf32, #tpu.memory_space<vmem>>, vector<300x128xf32>
    %cst = arith.constant dense<0.000000e+00> : vector<1x300xf32>
    %6 = tpu.matmul %4, %5, %cst {dimension_numbers = #tpu.dot_dimension_numbers<[1], [1], [0], [0], [0, 0, 1, 0], [], []>} : vector<1x128xf32>, vector<300x128xf32>, vector<1x300xf32> -> vector<1x300xf32>
    %7 = arith.addf %3, %6 : vector<1x300xf32>
    %c0_6 = arith.constant 0 : index
    %c0_7 = arith.constant 0 : index
    %8 = vector.load %arg6[%c0_6, %c0_7] : memref<1x300xf32, #tpu.memory_space<vmem>>, vector<1x300xf32>
    tpu.vector_store %arg6[%c0_6, %c0_7], %7 {strides = array<i32>} : memref<1x300xf32, #tpu.memory_space<vmem>>, vector<1x300xf32>,
    %c0_i32_8 = arith.constant 0 : i32
    %9 = arith.cmpi eq, %arg1, %c0_i32_8 : i32
    %10 = arith.extui %9 : i1 to i32
    %c0_i32_9 = arith.constant 0 : i32
    %11 = arith.cmpi ne, %10, %c0_i32_9 : i32
    scf.if %11 {
      %c0_10 = arith.constant 0 : index
      %c0_11 = arith.constant 0 : index
      %12 = vector.load %arg6[%c0_10, %c0_11] : memref<1x300xf32, #tpu.memory_space<vmem>>, vector<1x300xf32>
      %c0_12 = arith.constant 0 : index
      %13 = memref.load %arg4[%c0_12] : memref<1xf32, #tpu.memory_space<smem>>
      %14 = vector.broadcast %13 : f32 to vector<1x300xf32>
      %15 = arith.addf %12, %14 : vector<1x300xf32>
      %c0_13 = arith.constant 0 : index
      %c0_14 = arith.constant 0 : index
      %16 = vector.load %arg5[%c0_13, %c0_14] : memref<1x300xf32, #tpu.memory_space<vmem>>, vector<1x300xf32>
      tpu.vector_store %arg5[%c0_13, %c0_14], %15 {strides = array<i32>} : memref<1x300xf32, #tpu.memory_space<vmem>>, vector<1x300xf32>,
    } else {
    }
    return
  }
  func.func @transform_0(%arg0: i32, %arg1: i32) -> (i32, i32) {
    %c0_i32 = arith.constant 0 : i32
    return %arg0, %arg1 : i32, i32
  }
  func.func @transform_1(%arg0: i32, %arg1: i32) -> (i32, i32) {
    %c0_i32 = arith.constant 0 : i32
    %c0_i32_0 = arith.constant 0 : i32
    return %c0_i32, %arg1 : i32, i32
  }
  func.func @transform_2(%arg0: i32, %arg1: i32) -> i32 {
    %c0_i32 = arith.constant 0 : i32
    %c0_i32_0 = arith.constant 0 : i32
    return %c0_i32 : i32
  }
  func.func @transform_3(%arg0: i32, %arg1: i32) -> (i32, i32) {
    %c0_i32 = arith.constant 0 : i32
    %c0_i32_0 = arith.constant 0 : i32
    return %c0_i32, %arg0 : i32, i32
  }
}

</mosaic_0001>

<bundles_post_ra>
// kernel: tpu_custom_call.1
= control target key start
LH: loop header
LB: loop body
LE: loop exit
PB: predicated region body
PF: predicated region fallthrough
CT: control target
= control target key end

     0   :  { %9 = vsyncpa [#allocation5], 0  ;;  %s440_s0 = inlined_call_operand.hbm [shape: f32[300,128], index: 0, kind: input, shape index: {}]   ;;  %s441_s1 = inlined_call_operand.vmem [shape: f32[1,128], index: 1, kind: input, shape index: {}]   ;;  %s442_s2 = inlined_call_operand.<no memory space> [shape: f32[1], index: 2, kind: input, shape index: {}]   ;;  %s443_s3 = inlined_call_operand.hbm [shape: f32[1,300], index: 3, kind: output, shape index: {}]  }
   0x1   :  { %10 = vsyncpa [#allocation6], 0  ;;  %s383_s12 = smov [#allocation4]  }
   0x2   :  { %s16_s13 = sshll.u32 %s383_s12, 4  ;;  %s17_s13 = int_to_ptr.vmem [resolvable:$true] %s16_s13 }
   0x3   :  { %s347_s14 = scalar_lea.vmem %s17_s13, 4864  ;;  %p352_p1 = scmp.lt.s32.totalorder %s17_s13, %s17_s13 }
   0x4   :  { %p348_p0 = scmp.ne.s32.totalorder %s17_s13, %s347_s14  ;;  %p353_p2 = scmp.lt.s32.totalorder %s347_s14, %s347_s14 }
   0x6   :  { %p354_p3 = por %p353_p2, %p352_p1 }
   0x8   :  { %p355_p4 = pnand %p354_p3, %p348_p0 }
   0xa   :  { %358 = shalt.err (!%p355_p4)
}
   0xb   :  { %s384_s15 = smov 128   ;;  %s385_s16 = smov 8  }
   0xc   :  { %22 = dma.hbm_to_vmem [thread:$0]  %s440_s0, 4864, %s17_s13, [#allocation5], %s384_s15, %s384_s15, %s385_s16  }
   0xd   :  { %379 = dma.done.wait [#allocation5], 4864  }
   0xe   :  { %380 = vsyncadd [#allocation5], 4294962432  ;;  %v386_v0 = vmov 0.0   ;;  %vm387_vm0 = vmmov 0   ;;  %v72_v1 = vld [vmem:[#allocation4 + $0xf8] sm:$0xff]  ;;  %v71_v3 = vld [vmem:[#allocation4 + $0xf0] sm:$0xff]  ;;  %v34_v40 = vlaneseq  ;;  %v258_v58 = vstv %s442_s2 }
   0xf   :  { %317 = vmatprep.subr.mxu1 %v386_v0  ;;  %329 = vmatprep.mubr.msk.f32.mxu1 %vm387_vm0, %v386_v0  ;;  %v56_v2 = vld [vmem:[#allocation4 + $0x78] sm:$0xff]  ;;  %v55_v4 = vld [vmem:[#allocation4 + $0x70] sm:$0xff]  ;;  %v70_v5 = vld [vmem:[#allocation4 + $0xe8] sm:$0xff]  ;;  %v388_v44 = vmov 1966171168   ;;  %s389_s21 = smov [#allocation7]  }
  0x10   :  { %276 = vmatprep.subr.mxu0 %v72_v1  ;;  %v54_v6 = vld [vmem:[#allocation4 + $0x68] sm:$0xff]  ;;  %v69_v8 = vld [vmem:[#allocation4 + $0xe0] sm:$0xff]  ;;  %v68_v11 = vld [vmem:[#allocation4 + $0xd8] sm:$0xff]  ;;  %vm423_vm1 = vcmp.lt.s32.totalorder %v34_v40, 300  ;;  %v225_v45 = vunpack.c.l.s4 %v388_v44  ;;  %v228_v47 = vshrl.u32 %v34_v40, 7  ;;  %s267_s22 = sshll.u32 %s389_s21, 4  ;;  %s268_s22 = int_to_ptr.vmem [resolvable:$true] %s267_s22 }
  0x11   :  { %277 = vmatpush3.xpose.msra.mxu0 %v56_v2  ;;  %v78_v7 = vld [vmem:[#allocation4 + $0x128] sm:$0xf]  ;;  %v77_v9 = vld [vmem:[#allocation4 + $0x120] sm:$0xff]  ;;  %v40_v12 = vld [vmem:[%s441_s1] sm:$0x1]  ;;  %s359_s23 = scalar_lea.vmem %s268_s22, 48  ;;  %p364_p6 = scmp.lt.s32.totalorder %s268_s22, %s268_s22 }
  0x12   :  { %278 = vmatprep.subr.mxu0 %v71_v3  ;;  %318 = vmatpush3.xpose.msra.mxu1 %v78_v7  ;;  %v53_v10 = vld [vmem:[#allocation4 + $0x60] sm:$0xff]  ;;  %v76_v13 = vld [vmem:[#allocation4 + $0x118] sm:$0xff]  ;;  %v67_v15 = vld [vmem:[#allocation4 + $0xd0] sm:$0xff]  ;;  %38 = vst.msk [vmem:[#allocation2] sm:$0x7] %vm423_vm1, %v386_v0  ;;  %v226_v46 = vunpack.c.0.s8 %v225_v45  ;;  %p360_p5 = scmp.ne.s32.totalorder %s268_s22, %s359_s23  ;;  %s363_s24 = scalar_lea.vmem %s268_s22, 64 }
  0x13   :  { %319 = vmatprep.subr.mxu1 %v386_v0  ;;  %308 = vmatprep.mubr.f32.mxu0 %v40_v12  ;;  %v52_v14 = vld [vmem:[#allocation4 + $0x58] sm:$0xff]  ;;  %v75_v16 = vld [vmem:[#allocation4 + $0x110] sm:$0xff]  ;;  %v66_v18 = vld [vmem:[#allocation4 + $0xc8] sm:$0xff]  ;;  %p365_p7 = scmp.lt.s32.totalorder %s363_s24, %s359_s23 }
  0x14   :  { %v51_v17 = vld [vmem:[#allocation4 + $0x50] sm:$0xff]  ;;  %v74_v19 = vld [vmem:[#allocation4 + $0x108] sm:$0xff]  ;;  %v65_v21 = vld [vmem:[#allocation4 + $0xc0] sm:$0xff]  ;;  %v229_v48 = vsub.s32 %v226_v46, %v228_v47 }
  0x15   :  { %279 = vmatpush3.xpose.msra.mxu0 %v55_v4  ;;  %v50_v20 = vld [vmem:[#allocation4 + $0x48] sm:$0xff]  ;;  %v73_v22 = vld [vmem:[#allocation4 + $0x100] sm:$0xff]  ;;  %v64_v24 = vld [vmem:[#allocation4 + $0xb8] sm:$0xff]  ;;  %p366_p8 = por %p365_p7, %p364_p6 }
  0x16   :  { %280 = vmatprep.subr.mxu0 %v70_v5  ;;  %320 = vmatpush3.xpose.msra.mxu1 %v77_v9  ;;  %v49_v23 = vld [vmem:[#allocation4 + $0x40] sm:$0xff]  ;;  %v48_v25 = vld [vmem:[#allocation4 + $0x38] sm:$0xff]  ;;  %v63_v26 = vld [vmem:[#allocation4 + $0xb0] sm:$0xff] }
  0x17   :  { %321 = vmatprep.subr.mxu1 %v386_v0  ;;  %v47_v27 = vld [vmem:[#allocation4 + $0x30] sm:$0xff]  ;;  %v62_v28 = vld [vmem:[#allocation4 + $0xa8] sm:$0xff]  ;;  %v61_v30 = vld [vmem:[#allocation4 + $0xa0] sm:$0xff]  ;;  %p367_p9 = pnand %p366_p8, %p360_p5 }
  0x18   :  { %v46_v29 = vld [vmem:[#allocation4 + $0x28] sm:$0xff]  ;;  %v45_v31 = vld [vmem:[#allocation4 + $0x20] sm:$0xff]  ;;  %v60_v32 = vld [vmem:[#allocation4 + $0x98] sm:$0xff] }
  0x19   :  { %281 = vmatpush3.xpose.msra.mxu0 %v54_v6  ;;  %v44_v33 = vld [vmem:[#allocation4 + $0x18] sm:$0xff]  ;;  %v59_v34 = vld [vmem:[#allocation4 + $0x90] sm:$0xff]  ;;  %v58_v36 = vld [vmem:[#allocation4 + $0x88] sm:$0xff] }
  0x1a   :  { %282 = vmatprep.subr.mxu0 %v69_v8  ;;  %322 = vmatpush3.xpose.msra.mxu1 %v76_v13  ;;  %v43_v35 = vld [vmem:[#allocation4 + $0x10] sm:$0xff]  ;;  %v42_v37 = vld [vmem:[#allocation4 + $0x8] sm:$0xff]  ;;  %v57_v38 = vld [vmem:[#allocation4 + $0x80] sm:$0xff] }
  0x1b   :  { %323 = vmatprep.subr.mxu1 %v386_v0  ;;  %v41_v39 = vld [vmem:[#allocation4] sm:$0xff]  ;;  %v39_v55 = vld [vmem:[#allocation2] sm:$0x7] }
  0x1d   :  { %283 = vmatpush3.xpose.msra.mxu0 %v53_v10 }
  0x1e   :  { %284 = vmatprep.subr.mxu0 %v68_v11  ;;  %324 = vmatpush3.xpose.msra.mxu1 %v75_v16 }
  0x1f   :  { %325 = vmatprep.subr.mxu1 %v386_v0 }
  0x21   :  { %285 = vmatpush3.xpose.msra.mxu0 %v52_v14 }
  0x22   :  { %286 = vmatprep.subr.mxu0 %v67_v15  ;;  %326 = vmatpush3.xpose.msra.mxu1 %v74_v19 }
  0x23   :  { %327 = vmatprep.subr.mxu1 %v386_v0 }
  0x25   :  { %287 = vmatpush3.xpose.msra.mxu0 %v51_v17 }
  0x26   :  { %288 = vmatprep.subr.mxu0 %v66_v18  ;;  %328 = vmatpush3.xpose.msra.mxu1 %v73_v22 }
  0x29   :  { %289 = vmatpush3.xpose.msra.mxu0 %v50_v20  ;;  %330 = vmatmul.mubr.f32.vlgmr.msra.gmra.mxu1 %v40_v12 }
  0x2a   :  { %290 = vmatprep.subr.mxu0 %v65_v21 }
  0x2d   :  { %291 = vmatpush3.xpose.msra.mxu0 %v49_v23 }
  0x2e   :  { %292 = vmatprep.subr.mxu0 %v64_v24 }
  0x31   :  { %293 = vmatpush3.xpose.msra.mxu0 %v48_v25 }
  0x32   :  { %294 = vmatprep.subr.mxu0 %v63_v26 }
  0x35   :  { %295 = vmatpush3.xpose.msra.mxu0 %v47_v27 }
  0x36   :  { %296 = vmatprep.subr.mxu0 %v62_v28 }
  0x39   :  { %297 = vmatpush3.xpose.msra.mxu0 %v46_v29 }
  0x3a   :  { %298 = vmatprep.subr.mxu0 %v61_v30 }
  0x3d   :  { %299 = vmatpush3.xpose.msra.mxu0 %v45_v31 }
  0x3e   :  { %300 = vmatprep.subr.mxu0 %v60_v32 }
  0x41   :  { %301 = vmatpush3.xpose.msra.mxu0 %v44_v33 }
  0x42   :  { %302 = vmatprep.subr.mxu0 %v59_v34 }
  0x45   :  { %303 = vmatpush3.xpose.msra.mxu0 %v43_v35 }
  0x46   :  { %304 = vmatprep.subr.mxu0 %v58_v36 }
  0x49   :  { %305 = vmatpush3.xpose.msra.mxu0 %v42_v37 }
  0x4a   :  { %306 = vmatprep.subr.mxu0 %v57_v38 }
  0x4d   :  { %307 = vmatpush3.xpose.msra.mxu0 %v41_v39 }
  0x50   :  { %309 = vmatmul.mubr.f32.vlgmr.msra.gmra.mxu0 %v40_v12 }
  0xe9   :  { %v216_v42 = vpop.f32.mrf.mxu1 }
  0xea   :  { %v237_v52 = vrot.slane %v216_v42, %v229_v48 }
  0xeb   :  { %v331_v43 = vpop.f32.mrf.mxu1 }
 0x110   :  { %v145_v49 = vpop.f32.mrf.mxu0 }
 0x112   :  { %v147_v50 = vpop.f32.mrf.mxu0 }
 0x113   :  { %v223_v51 = vcombine.low %v145_v49, %v147_v50 }
 0x115   :  { %v230_v53 = vrot.slane %v223_v51, %v229_v48 }
 0x117   :  { %v238_v54 = vcombine.low %v230_v53, %v237_v52 }
 0x119   :  { %v245_v56 = vrot.slane %v238_v54, %v229_v48 }
 0x11b   :  { %v247_v57 = vadd.f32 %v245_v56, %v39_v55 }
 0x11d   :  { %252 = vst.msk [vmem:[#allocation2] sm:$0x7] %vm423_vm1, %v247_v57 }
 0x124   :  { %v256_v59 = vld [vmem:[#allocation2] sm:$0x7] }
 0x125   :  { %v259_v60 = vadd.f32 %v258_v58, %v256_v59 }
 0x127   :  { %260 = vst.msk [vmem:[#allocation7] sm:$0x7] %vm423_vm1, %v259_v60 }
 0x128   :  { %370 = shalt.err (!%p367_p9)
}
 0x129   :  { %270 = dma.vmem_to_hbm [thread:$0]  %s268_s22, 48, %s443_s3, [#allocation6]  }
 0x12a   :  { %381 = dma.done.wait [#allocation6], 48  }
 0x12b   :  { %382 = vsyncadd [#allocation6], 4294967248 }
 0x12c   :  { %274 = vsyncpa [#allocation5], 1 }
 0x12d   :  { %275 = vsyncpa [#allocation6], 1 }

</bundles_post_ra>
